<compile_context>
chip_gen: v6e
topology: v6e:2x2x1
jax: 0.10.0
libtpu: 0.0.40
codegen_flags: <defaults>
</compile_context>

<pallas_src>
import math
import functools

import jax
import jax.numpy as jnp
from jax.experimental import pallas as pl
from jax.experimental.pallas import tpu as pltpu


def _round_up(x, m):
    return (x + m - 1) // m * m


def _ffn_kernel(x_ref, temb_ref,
                w0_ref, b0_ref, w1_ref, b1_ref, w2_ref, b2_ref,
                w3_ref, b3_ref, w4_ref, b4_ref, w5_ref, b5_ref,
                w6_ref, b6_ref, o_ref):
    """One batch tile: full FFN forward.

    Weights arrive pre-transposed (in_features, out_features); biases as (1, out).
    """
    x = x_ref[...]

    # init_embed: x @ W0^T + b0   (W already transposed host-side)
    h = jnp.dot(x, w0_ref[...], preferred_element_type=jnp.float32) + b0_ref[...]

    # add time / positional embedding (gathered in the wrapper)
    h = h + temb_ref[...]

    # 5 x (Linear + ReLU)
    for w_ref, b_ref in ((w1_ref, b1_ref), (w2_ref, b2_ref), (w3_ref, b3_ref),
                         (w4_ref, b4_ref), (w5_ref, b5_ref)):
        h = jnp.dot(h.astype(w_ref.dtype), w_ref[...],
                    preferred_element_type=jnp.float32) + b_ref[...]
        h = jnp.maximum(h, 0.0)

    # final projection back to in_dim
    out = jnp.dot(h.astype(w6_ref.dtype), w6_ref[...],
                  preferred_element_type=jnp.float32) + b6_ref[...]
    o_ref[...] = out.astype(o_ref.dtype)


def make_positional_embedding(dim, max_length=10000):
    """Matches PositionalEmbedding.make_embedding in the PyTorch module."""
    position = jnp.arange(max_length, dtype=jnp.float32)[:, None]
    div_term = jnp.exp(jnp.arange(0, dim, 2, dtype=jnp.float32)
                       * (-math.log(max_length / 2.0 / math.pi) / dim))
    ang = position * div_term
    emb = jnp.zeros((max_length, dim), jnp.float32)
    emb = emb.at[:, 0::2].set(jnp.sin(ang))
    emb = emb.at[:, 1::2].set(jnp.cos(ang))
    return emb


def ffn_forward(x, t, params, emb_table, *, b_tile=None,
                compute_dtype=jnp.float32):
    """FFN forward.

    x:          (bsz, in_dim) float32
    t:          (bsz,) int32 timestep indices
    params:     list of 7 (w, b) pairs in PyTorch layout: w (out, in), b (out,)
                order = [init_embed, hidden1..hidden5, final]
    emb_table:  (max_length, embed_dim) positional embedding table
    """
    bsz, in_dim = x.shape
    embed_dim = params[0][0].shape[0]

    # -------- host-side layout plumbing (done once, outside the hot loop) ----
    # positional-embedding gather: pure memory op, no compute
    t_emb = emb_table[t]                                   # (bsz, embed_dim)

    in_p = _round_up(in_dim, 128)     # lane-dense feature dims
    emb_p = _round_up(embed_dim, 128)

    if b_tile is None:
        b_tile = min(_round_up(bsz, 8), 256)
    bsz_p = _round_up(bsz, b_tile)

    def pad2(a, rows, cols):
        return jnp.pad(a, ((0, rows - a.shape[0]), (0, cols - a.shape[1])))

    x_p = pad2(x, bsz_p, in_p).astype(compute_dtype)
    t_p = pad2(t_emb, bsz_p, emb_p).astype(jnp.float32)

    # pre-transpose + zero-pad weights; biases kept fp32 (added post-accumulation)
    def prep(w, b, rows_p, cols_p):
        w_t = jnp.pad(w.T, ((0, rows_p - w.shape[1]), (0, cols_p - w.shape[0])))
        bb = jnp.pad(b, (0, cols_p - b.shape[0])).reshape(1, cols_p)
        return w_t.astype(compute_dtype), bb.astype(jnp.float32)

    layer_pads = [(in_p, emb_p)] + [(emb_p, emb_p)] * 5 + [(emb_p, in_p)]
    flat_params = []
    for (w, b), (rp, cp) in zip(params, layer_pads):
        wt, bb = prep(w, b, rp, cp)
        flat_params.extend((wt, bb))

    # -------- pallas_call -----------------------------------------------------
    in_specs = [
        pl.BlockSpec((b_tile, in_p), lambda i: (i, 0)),    # x tile
        pl.BlockSpec((b_tile, emb_p), lambda i: (i, 0)),   # t_emb tile
    ]
    for a in flat_params:                                  # full, loop-invariant
        in_specs.append(pl.BlockSpec(a.shape, lambda i: (0, 0)))

    grid_spec = pl.GridSpec(
        grid=(bsz_p // b_tile,),
        in_specs=in_specs,
        out_specs=pl.BlockSpec((b_tile, in_p), lambda i: (i, 0)),
    )

    out_p = pl.pallas_call(
        _ffn_kernel,
        out_shape=jax.ShapeDtypeStruct((bsz_p, in_p), jnp.float32),
        grid_spec=grid_spec,
        compiler_params=pltpu.CompilerParams(
            dimension_semantics=("parallel",)),
    )(x_p, t_p, *flat_params)

    return out_p[:bsz, :in_dim]


def _reference(x, t, params, emb_table):
    """Pure-JAX transcription of the PyTorch FFN.forward."""
    w0, b0 = params[0]
    h = x @ w0.T + b0
    h = h + emb_table[t]
    for w, b in params[1:6]:
        h = jax.nn.relu(h @ w.T + b)
    w6, b6 = params[6]
    return h @ w6.T + b6


if __name__ == "__main__":
    in_dim, embed_dim = 4, 32
    bsz = 8
    max_length = 10000

    key = jax.random.PRNGKey(0)
    keys = jax.random.split(key, 16)

    x = jax.random.normal(keys[0], (bsz, in_dim), dtype=jnp.float32)
    t = jax.random.randint(keys[1], (bsz,), 0, max_length)

    def linear_params(kw, kb, out_f, in_f):
        bound = 1.0 / math.sqrt(in_f)
        w = jax.random.uniform(kw, (out_f, in_f), jnp.float32, -bound, bound)
        b = jax.random.uniform(kb, (out_f,), jnp.float32, -bound, bound)
        return w, b

    layer_dims = [(embed_dim, in_dim)] + [(embed_dim, embed_dim)] * 5 \
                 + [(in_dim, embed_dim)]
    params = []
    for li, (of, inf) in enumerate(layer_dims):
        params.append(linear_params(keys[2 + 2 * li], keys[3 + 2 * li], of, inf))

    emb_table = make_positional_embedding(embed_dim, max_length)

    out = ffn_forward(x, t, params, emb_table)
    out = jax.block_until_ready(out)

    ref = _reference(x, t, params, emb_table)
    assert out.shape == (bsz, in_dim)
    assert jnp.allclose(out, ref, atol=1e-4, rtol=1e-4), "mismatch vs reference"

    print("KERNEL_OK")
</pallas_src>

<mosaic_0001>
module attributes {stable_mosaic.version = 11 : i64} {
  func.func @_ffn_kernel(%arg0: i32, %arg1: memref<8x128xf32, #tpu.memory_space<vmem>>, %arg2: memref<8x128xf32, #tpu.memory_space<vmem>>, %arg3: memref<128x128xf32, #tpu.memory_space<vmem>>, %arg4: memref<1x128xf32, #tpu.memory_space<vmem>>, %arg5: memref<128x128xf32, #tpu.memory_space<vmem>>, %arg6: memref<1x128xf32, #tpu.memory_space<vmem>>, %arg7: memref<128x128xf32, #tpu.memory_space<vmem>>, %arg8: memref<1x128xf32, #tpu.memory_space<vmem>>, %arg9: memref<128x128xf32, #tpu.memory_space<vmem>>, %arg10: memref<1x128xf32, #tpu.memory_space<vmem>>, %arg11: memref<128x128xf32, #tpu.memory_space<vmem>>, %arg12: memref<1x128xf32, #tpu.memory_space<vmem>>, %arg13: memref<128x128xf32, #tpu.memory_space<vmem>>, %arg14: memref<1x128xf32, #tpu.memory_space<vmem>>, %arg15: memref<128x128xf32, #tpu.memory_space<vmem>>, %arg16: memref<1x128xf32, #tpu.memory_space<vmem>>, %arg17: memref<8x128xf32, #tpu.memory_space<vmem>>) attributes {dimension_semantics = [#tpu.dimension_semantics<parallel>], iteration_bounds = array<i64: 1>, scalar_prefetch = 0 : i64, scratch_operands = 0 : i64, tpu.core_type = #tpu.core_type<tc>, window_params = [{transform_indices = @transform_0, window_bounds = array<i64: 8, 128>}, {transform_indices = @transform_1, window_bounds = array<i64: 8, 128>}, {pipeline_mode = #tpu.pipeline_mode<synchronous>, transform_indices = @transform_2, window_bounds = array<i64: 128, 128>}, {pipeline_mode = #tpu.pipeline_mode<synchronous>, transform_indices = @transform_3, window_bounds = array<i64: 1, 128>}, {pipeline_mode = #tpu.pipeline_mode<synchronous>, transform_indices = @transform_4, window_bounds = array<i64: 128, 128>}, {pipeline_mode = #tpu.pipeline_mode<synchronous>, transform_indices = @transform_5, window_bounds = array<i64: 1, 128>}, {pipeline_mode = #tpu.pipeline_mode<synchronous>, transform_indices = @transform_6, window_bounds = array<i64: 128, 128>}, {pipeline_mode = #tpu.pipeline_mode<synchronous>, transform_indices = @transform_7, window_bounds = array<i64: 1, 128>}, {pipeline_mode = #tpu.pipeline_mode<synchronous>, transform_indices = @transform_8, window_bounds = array<i64: 128, 128>}, {pipeline_mode = #tpu.pipeline_mode<synchronous>, transform_indices = @transform_9, window_bounds = array<i64: 1, 128>}, {pipeline_mode = #tpu.pipeline_mode<synchronous>, transform_indices = @transform_10, window_bounds = array<i64: 128, 128>}, {pipeline_mode = #tpu.pipeline_mode<synchronous>, transform_indices = @transform_11, window_bounds = array<i64: 1, 128>}, {pipeline_mode = #tpu.pipeline_mode<synchronous>, transform_indices = @transform_12, window_bounds = array<i64: 128, 128>}, {pipeline_mode = #tpu.pipeline_mode<synchronous>, transform_indices = @transform_13, window_bounds = array<i64: 1, 128>}, {pipeline_mode = #tpu.pipeline_mode<synchronous>, transform_indices = @transform_14, window_bounds = array<i64: 128, 128>}, {pipeline_mode = #tpu.pipeline_mode<synchronous>, transform_indices = @transform_15, window_bounds = array<i64: 1, 128>}, {transform_indices = @transform_16, window_bounds = array<i64: 8, 128>}]} {
    %c0 = arith.constant 0 : index
    %c0_0 = arith.constant 0 : index
    %0 = vector.load %arg1[%c0, %c0_0] : memref<8x128xf32, #tpu.memory_space<vmem>>, vector<8x128xf32>
    %c0_1 = arith.constant 0 : index
    %c0_2 = arith.constant 0 : index
    %1 = vector.load %arg3[%c0_1, %c0_2] : memref<128x128xf32, #tpu.memory_space<vmem>>, vector<128x128xf32>
    %cst = arith.constant dense<0.000000e+00> : vector<8x128xf32>
    %2 = tpu.matmul %0, %1, %cst {dimension_numbers = #tpu.dot_dimension_numbers<[1], [0], [0], [1], [0, 0, 1, 1], [], []>} : vector<8x128xf32>, vector<128x128xf32>, vector<8x128xf32> -> vector<8x128xf32>
    %c0_3 = arith.constant 0 : index
    %c0_4 = arith.constant 0 : index
    %3 = vector.load %arg4[%c0_3, %c0_4] : memref<1x128xf32, #tpu.memory_space<vmem>>, vector<1x128xf32>
    %4 = vector.broadcast %3 : vector<1x128xf32> to vector<8x128xf32>
    %5 = arith.addf %2, %4 : vector<8x128xf32>
    %c0_5 = arith.constant 0 : index
    %c0_6 = arith.constant 0 : index
    %6 = vector.load %arg2[%c0_5, %c0_6] : memref<8x128xf32, #tpu.memory_space<vmem>>, vector<8x128xf32>
    %7 = arith.addf %5, %6 : vector<8x128xf32>
    %c0_7 = arith.constant 0 : index
    %c0_8 = arith.constant 0 : index
    %8 = vector.load %arg5[%c0_7, %c0_8] : memref<128x128xf32, #tpu.memory_space<vmem>>, vector<128x128xf32>
    %cst_9 = arith.constant dense<0.000000e+00> : vector<8x128xf32>
    %9 = tpu.matmul %7, %8, %cst_9 {dimension_numbers = #tpu.dot_dimension_numbers<[1], [0], [0], [1], [0, 0, 1, 1], [], []>} : vector<8x128xf32>, vector<128x128xf32>, vector<8x128xf32> -> vector<8x128xf32>
    %c0_10 = arith.constant 0 : index
    %c0_11 = arith.constant 0 : index
    %10 = vector.load %arg6[%c0_10, %c0_11] : memref<1x128xf32, #tpu.memory_space<vmem>>, vector<1x128xf32>
    %11 = vector.broadcast %10 : vector<1x128xf32> to vector<8x128xf32>
    %12 = arith.addf %9, %11 : vector<8x128xf32>
    %cst_12 = arith.constant 0.000000e+00 : f32
    %13 = vector.broadcast %cst_12 : f32 to vector<8x128xf32>
    %14 = arith.maximumf %12, %13 : vector<8x128xf32>
    %c0_13 = arith.constant 0 : index
    %c0_14 = arith.constant 0 : index
    %15 = vector.load %arg7[%c0_13, %c0_14] : memref<128x128xf32, #tpu.memory_space<vmem>>, vector<128x128xf32>
    %cst_15 = arith.constant dense<0.000000e+00> : vector<8x128xf32>
    %16 = tpu.matmul %14, %15, %cst_15 {dimension_numbers = #tpu.dot_dimension_numbers<[1], [0], [0], [1], [0, 0, 1, 1], [], []>} : vector<8x128xf32>, vector<128x128xf32>, vector<8x128xf32> -> vector<8x128xf32>
    %c0_16 = arith.constant 0 : index
    %c0_17 = arith.constant 0 : index
    %17 = vector.load %arg8[%c0_16, %c0_17] : memref<1x128xf32, #tpu.memory_space<vmem>>, vector<1x128xf32>
    %18 = vector.broadcast %17 : vector<1x128xf32> to vector<8x128xf32>
    %19 = arith.addf %16, %18 : vector<8x128xf32>
    %cst_18 = arith.constant 0.000000e+00 : f32
    %20 = vector.broadcast %cst_18 : f32 to vector<8x128xf32>
    %21 = arith.maximumf %19, %20 : vector<8x128xf32>
    %c0_19 = arith.constant 0 : index
    %c0_20 = arith.constant 0 : index
    %22 = vector.load %arg9[%c0_19, %c0_20] : memref<128x128xf32, #tpu.memory_space<vmem>>, vector<128x128xf32>
    %cst_21 = arith.constant dense<0.000000e+00> : vector<8x128xf32>
    %23 = tpu.matmul %21, %22, %cst_21 {dimension_numbers = #tpu.dot_dimension_numbers<[1], [0], [0], [1], [0, 0, 1, 1], [], []>} : vector<8x128xf32>, vector<128x128xf32>, vector<8x128xf32> -> vector<8x128xf32>
    %c0_22 = arith.constant 0 : index
    %c0_23 = arith.constant 0 : index
    %24 = vector.load %arg10[%c0_22, %c0_23] : memref<1x128xf32, #tpu.memory_space<vmem>>, vector<1x128xf32>
    %25 = vector.broadcast %24 : vector<1x128xf32> to vector<8x128xf32>
    %26 = arith.addf %23, %25 : vector<8x128xf32>
    %cst_24 = arith.constant 0.000000e+00 : f32
    %27 = vector.broadcast %cst_24 : f32 to vector<8x128xf32>
    %28 = arith.maximumf %26, %27 : vector<8x128xf32>
    %c0_25 = arith.constant 0 : index
    %c0_26 = arith.constant 0 : index
    %29 = vector.load %arg11[%c0_25, %c0_26] : memref<128x128xf32, #tpu.memory_space<vmem>>, vector<128x128xf32>
    %cst_27 = arith.constant dense<0.000000e+00> : vector<8x128xf32>
    %30 = tpu.matmul %28, %29, %cst_27 {dimension_numbers = #tpu.dot_dimension_numbers<[1], [0], [0], [1], [0, 0, 1, 1], [], []>} : vector<8x128xf32>, vector<128x128xf32>, vector<8x128xf32> -> vector<8x128xf32>
    %c0_28 = arith.constant 0 : index
    %c0_29 = arith.constant 0 : index
    %31 = vector.load %arg12[%c0_28, %c0_29] : memref<1x128xf32, #tpu.memory_space<vmem>>, vector<1x128xf32>
    %32 = vector.broadcast %31 : vector<1x128xf32> to vector<8x128xf32>
    %33 = arith.addf %30, %32 : vector<8x128xf32>
    %cst_30 = arith.constant 0.000000e+00 : f32
    %34 = vector.broadcast %cst_30 : f32 to vector<8x128xf32>
    %35 = arith.maximumf %33, %34 : vector<8x128xf32>
    %c0_31 = arith.constant 0 : index
    %c0_32 = arith.constant 0 : index
    %36 = vector.load %arg13[%c0_31, %c0_32] : memref<128x128xf32, #tpu.memory_space<vmem>>, vector<128x128xf32>
    %cst_33 = arith.constant dense<0.000000e+00> : vector<8x128xf32>
    %37 = tpu.matmul %35, %36, %cst_33 {dimension_numbers = #tpu.dot_dimension_numbers<[1], [0], [0], [1], [0, 0, 1, 1], [], []>} : vector<8x128xf32>, vector<128x128xf32>, vector<8x128xf32> -> vector<8x128xf32>
    %c0_34 = arith.constant 0 : index
    %c0_35 = arith.constant 0 : index
    %38 = vector.load %arg14[%c0_34, %c0_35] : memref<1x128xf32, #tpu.memory_space<vmem>>, vector<1x128xf32>
    %39 = vector.broadcast %38 : vector<1x128xf32> to vector<8x128xf32>
    %40 = arith.addf %37, %39 : vector<8x128xf32>
    %cst_36 = arith.constant 0.000000e+00 : f32
    %41 = vector.broadcast %cst_36 : f32 to vector<8x128xf32>
    %42 = arith.maximumf %40, %41 : vector<8x128xf32>
    %c0_37 = arith.constant 0 : index
    %c0_38 = arith.constant 0 : index
    %43 = vector.load %arg15[%c0_37, %c0_38] : memref<128x128xf32, #tpu.memory_space<vmem>>, vector<128x128xf32>
    %cst_39 = arith.constant dense<0.000000e+00> : vector<8x128xf32>
    %44 = tpu.matmul %42, %43, %cst_39 {dimension_numbers = #tpu.dot_dimension_numbers<[1], [0], [0], [1], [0, 0, 1, 1], [], []>} : vector<8x128xf32>, vector<128x128xf32>, vector<8x128xf32> -> vector<8x128xf32>
    %c0_40 = arith.constant 0 : index
    %c0_41 = arith.constant 0 : index
    %45 = vector.load %arg16[%c0_40, %c0_41] : memref<1x128xf32, #tpu.memory_space<vmem>>, vector<1x128xf32>
    %46 = vector.broadcast %45 : vector<1x128xf32> to vector<8x128xf32>
    %47 = arith.addf %44, %46 : vector<8x128xf32>
    %c0_42 = arith.constant 0 : index
    %c0_43 = arith.constant 0 : index
    %48 = vector.load %arg17[%c0_42, %c0_43] : memref<8x128xf32, #tpu.memory_space<vmem>>, vector<8x128xf32>
    tpu.vector_store %arg17[%c0_42, %c0_43], %47 {strides = array<i32>} : memref<8x128xf32, #tpu.memory_space<vmem>>, vector<8x128xf32>,
    return
  }
  func.func @transform_0(%arg0: i32) -> (i32, i32) {
    %c0_i32 = arith.constant 0 : i32
    %c0_i32_0 = arith.constant 0 : i32
    return %arg0, %c0_i32 : i32, i32
  }
  func.func @transform_1(%arg0: i32) -> (i32, i32) {
    %c0_i32 = arith.constant 0 : i32
    %c0_i32_0 = arith.constant 0 : i32
    return %arg0, %c0_i32 : i32, i32
  }
  func.func @transform_2(%arg0: i32) -> (i32, i32) {
    %c0_i32 = arith.constant 0 : i32
    %c0_i32_0 = arith.constant 0 : i32
    %c0_i32_1 = arith.constant 0 : i32
    return %c0_i32, %c0_i32_0 : i32, i32
  }
  func.func @transform_3(%arg0: i32) -> (i32, i32) {
    %c0_i32 = arith.constant 0 : i32
    %c0_i32_0 = arith.constant 0 : i32
    %c0_i32_1 = arith.constant 0 : i32
    return %c0_i32, %c0_i32_0 : i32, i32
  }
  func.func @transform_4(%arg0: i32) -> (i32, i32) {
    %c0_i32 = arith.constant 0 : i32
    %c0_i32_0 = arith.constant 0 : i32
    %c0_i32_1 = arith.constant 0 : i32
    return %c0_i32, %c0_i32_0 : i32, i32
  }
  func.func @transform_5(%arg0: i32) -> (i32, i32) {
    %c0_i32 = arith.constant 0 : i32
    %c0_i32_0 = arith.constant 0 : i32
    %c0_i32_1 = arith.constant 0 : i32
    return %c0_i32, %c0_i32_0 : i32, i32
  }
  func.func @transform_6(%arg0: i32) -> (i32, i32) {
    %c0_i32 = arith.constant 0 : i32
    %c0_i32_0 = arith.constant 0 : i32
    %c0_i32_1 = arith.constant 0 : i32
    return %c0_i32, %c0_i32_0 : i32, i32
  }
  func.func @transform_7(%arg0: i32) -> (i32, i32) {
    %c0_i32 = arith.constant 0 : i32
    %c0_i32_0 = arith.constant 0 : i32
    %c0_i32_1 = arith.constant 0 : i32
    return %c0_i32, %c0_i32_0 : i32, i32
  }
  func.func @transform_8(%arg0: i32) -> (i32, i32) {
    %c0_i32 = arith.constant 0 : i32
    %c0_i32_0 = arith.constant 0 : i32
    %c0_i32_1 = arith.constant 0 : i32
    return %c0_i32, %c0_i32_0 : i32, i32
  }
  func.func @transform_9(%arg0: i32) -> (i32, i32) {
    %c0_i32 = arith.constant 0 : i32
    %c0_i32_0 = arith.constant 0 : i32
    %c0_i32_1 = arith.constant 0 : i32
    return %c0_i32, %c0_i32_0 : i32, i32
  }
  func.func @transform_10(%arg0: i32) -> (i32, i32) {
    %c0_i32 = arith.constant 0 : i32
    %c0_i32_0 = arith.constant 0 : i32
    %c0_i32_1 = arith.constant 0 : i32
    return %c0_i32, %c0_i32_0 : i32, i32
  }
  func.func @transform_11(%arg0: i32) -> (i32, i32) {
    %c0_i32 = arith.constant 0 : i32
    %c0_i32_0 = arith.constant 0 : i32
    %c0_i32_1 = arith.constant 0 : i32
    return %c0_i32, %c0_i32_0 : i32, i32
  }
  func.func @transform_12(%arg0: i32) -> (i32, i32) {
    %c0_i32 = arith.constant 0 : i32
    %c0_i32_0 = arith.constant 0 : i32
    %c0_i32_1 = arith.constant 0 : i32
    return %c0_i32, %c0_i32_0 : i32, i32
  }
  func.func @transform_13(%arg0: i32) -> (i32, i32) {
    %c0_i32 = arith.constant 0 : i32
    %c0_i32_0 = arith.constant 0 : i32
    %c0_i32_1 = arith.constant 0 : i32
    return %c0_i32, %c0_i32_0 : i32, i32
  }
  func.func @transform_14(%arg0: i32) -> (i32, i32) {
    %c0_i32 = arith.constant 0 : i32
    %c0_i32_0 = arith.constant 0 : i32
    %c0_i32_1 = arith.constant 0 : i32
    return %c0_i32, %c0_i32_0 : i32, i32
  }
  func.func @transform_15(%arg0: i32) -> (i32, i32) {
    %c0_i32 = arith.constant 0 : i32
    %c0_i32_0 = arith.constant 0 : i32
    %c0_i32_1 = arith.constant 0 : i32
    return %c0_i32, %c0_i32_0 : i32, i32
  }
  func.func @transform_16(%arg0: i32) -> (i32, i32) {
    %c0_i32 = arith.constant 0 : i32
    %c0_i32_0 = arith.constant 0 : i32
    return %arg0, %c0_i32 : i32, i32
  }
}

</mosaic_0001>

<bundles_post_ra>
// kernel: tpu_custom_call.1
= control target key start
LH: loop header
LB: loop body
LE: loop exit
PB: predicated region body
PF: predicated region fallthrough
CT: control target
= control target key end

     0   :  { %s1745_s0 = inlined_call_operand.hbm [shape: f32[8,128], index: 0, kind: input, shape index: {}]   ;;  %s1746_s1 = inlined_call_operand.hbm [shape: f32[8,128], index: 1, kind: input, shape index: {}]   ;;  %s1747_s2 = inlined_call_operand.hbm [shape: f32[128,128], index: 2, kind: input, shape index: {}]   ;;  %s1748_s3 = inlined_call_operand.vmem [shape: f32[1,128], index: 3, kind: input, shape index: {}]   ;;  %s1749_s4 = inlined_call_operand.hbm [shape: f32[128,128], index: 4, kind: input, shape index: {}]   ;;  %s1750_s5 = inlined_call_operand.vmem [shape: f32[1,128], index: 5, kind: input, shape index: {}]   ;;  %s1751_s6 = inlined_call_operand.hbm [shape: f32[128,128], index: 6, kind: input, shape index: {}]   ;;  %s1752_s7 = inlined_call_operand.vmem [shape: f32[1,128], index: 7, kind: input, shape index: {}]   ;;  %s1753_s8 = inlined_call_operand.hbm [shape: f32[128,128], index: 8, kind: input, shape index: {}]   ;;  %s1754_s9 = inlined_call_operand.vmem [shape: f32[1,128], index: 9, kind: input, shape index: {}]   ;;  %s1755_s10 = inlined_call_operand.hbm [shape: f32[128,128], index: 10, kind: input, shape index: {}]   ;;  %s1756_s11 = inlined_call_operand.vmem [shape: f32[1,128], index: 11, kind: input, shape index: {}]   ;;  %s1757_s12 = inlined_call_operand.hbm [shape: f32[128,128], index: 12, kind: input, shape index: {}]   ;;  %s1758_s13 = inlined_call_operand.vmem [shape: f32[1,128], index: 13, kind: input, shape index: {}]   ;;  %s1759_s14 = inlined_call_operand.hbm [shape: f32[128,128], index: 14, kind: input, shape index: {}]   ;;  %s1760_s15 = inlined_call_operand.vmem [shape: f32[1,128], index: 15, kind: input, shape index: {}]   ;;  %s1761_s16 = inlined_call_operand.hbm [shape: f32[8,128], index: 16, kind: output, shape index: {}]  }
   0x1   :  { %1762 = sst [smem:[#allocation24_spill]] %s1745_s0 }
   0x2   :  { %21 = vsyncpa [#allocation3], 0 }
   0x3   :  { %22 = vsyncpa [#allocation6], 0 }
   0x4   :  { %23 = vsyncpa [#allocation9], 0 }
   0x5   :  { %24 = vsyncpa [#allocation12], 0 }
   0x6   :  { %25 = vsyncpa [#allocation15], 0 }
   0x7   :  { %26 = vsyncpa [#allocation4], 0  ;;  %s1448_s21 = smov [#allocation5]  }
   0x8   :  { %s43_s22 = sshll.u32 %s1448_s21, 4  ;;  %s44_s22 = int_to_ptr.vmem [resolvable:$true] %s43_s22 }
   0x9   :  { %s1244_s23 = scalar_lea.vmem %s44_s22, 128  ;;  %p1249_p1 = scmp.lt.s32.totalorder %s44_s22, %s44_s22 }
   0xa   :  { %p1245_p0 = scmp.ne.s32.totalorder %s44_s22, %s1244_s23  ;;  %p1250_p2 = scmp.lt.s32.totalorder %s1244_s23, %s1244_s23 }
   0xc   :  { %p1251_p3 = por %p1250_p2, %p1249_p1 }
   0xe   :  { %p1252_p4 = pnand %p1251_p3, %p1245_p0 }
  0x10   :  { %1255 = shalt.err (!%p1252_p4)
}
  0x11   :  { %46 = dma.hbm_to_vmem [thread:$0]  %s1746_s1, 128, %s44_s22, [#allocation6]  }
  0x12   :  { %s1449_s26 = smov [#allocation8]   ;;  %s1450_s28 = smov [#allocation11]  }
  0x13   :  { %s66_s27 = sshll.u32 %s1449_s26, 4  ;;  %s94_s29 = sshll.u32 %s1450_s28, 4  ;;  %s67_s27 = int_to_ptr.vmem [resolvable:$true] %s66_s27  ;;  %s95_s29 = int_to_ptr.vmem [resolvable:$true] %s94_s29 }
  0x14   :  { %s1264_s30 = scalar_lea.vmem %s67_s27, 2048  ;;  %p1269_p6 = scmp.lt.s32.totalorder %s67_s27, %s67_s27 }
  0x15   :  { %p1265_p5 = scmp.ne.s32.totalorder %s67_s27, %s1264_s30  ;;  %p1270_p7 = scmp.lt.s32.totalorder %s1264_s30, %s1264_s30 }
  0x17   :  { %p1271_p8 = por %p1270_p7, %p1269_p6 }
  0x19   :  { %p1272_p9 = pnand %p1271_p8, %p1265_p5 }
  0x1b   :  { %1275 = shalt.err (!%p1272_p9)
}
  0x1c   :  { %s1451_s0 = smov 128   ;;  %s1452_s17 = smov 8  }
  0x1d   :  { %72 = dma.hbm_to_vmem [thread:$0]  %s1749_s4, 2048, %s67_s27, [#allocation9], %s1451_s0, %s1451_s0, %s1452_s17  }
  0x1e   :  { %s1284_s1 = scalar_lea.vmem %s95_s29, 2048  ;;  %p1289_p11 = scmp.lt.s32.totalorder %s95_s29, %s95_s29 }
  0x1f   :  { %p1285_p10 = scmp.ne.s32.totalorder %s95_s29, %s1284_s1  ;;  %p1290_p12 = scmp.lt.s32.totalorder %s1284_s1, %s1284_s1 }
  0x21   :  { %p1291_p13 = por %p1290_p12, %p1289_p11 }
  0x23   :  { %p1292_p0 = pnand %p1291_p13, %p1285_p10 }
  0x25   :  { %1295 = shalt.err (!%p1292_p0)
}
  0x26   :  { %100 = dma.hbm_to_vmem [thread:$0]  %s1753_s8, 2048, %s95_s29, [#allocation12], %s1451_s0, %s1451_s0, %s1452_s17  }
  0x27   :  { %s1453_s22 = smov [#allocation14]   ;;  %s1454_s24 = smov [#allocation2]  }
  0x28   :  { %s122_s23 = sshll.u32 %s1453_s22, 4  ;;  %s33_s4 = sshll.u32 %s1454_s24, 4  ;;  %s123_s23 = int_to_ptr.vmem [resolvable:$true] %s122_s23  ;;  %s34_s4 = int_to_ptr.vmem [resolvable:$true] %s33_s4 }
  0x29   :  { %s1304_s25 = scalar_lea.vmem %s123_s23, 2048  ;;  %p1309_p2 = scmp.lt.s32.totalorder %s123_s23, %s123_s23 }
  0x2a   :  { %p1305_p1 = scmp.ne.s32.totalorder %s123_s23, %s1304_s25  ;;  %p1310_p3 = scmp.lt.s32.totalorder %s1304_s25, %s1304_s25 }
  0x2c   :  { %p1311_p4 = por %p1310_p3, %p1309_p2 }
  0x2e   :  { %p1312_p5 = pnand %p1311_p4, %p1305_p1 }
  0x30   :  { %1315 = shalt.err (!%p1312_p5)
}
  0x31   :  { %128 = dma.hbm_to_vmem [thread:$0]  %s1757_s12, 2048, %s123_s23, [#allocation15], %s1451_s0, %s1451_s0, %s1452_s17  }
  0x32   :  { %s1324_s8 = scalar_lea.vmem %s34_s4, 128  ;;  %p1329_p7 = scmp.lt.s32.totalorder %s34_s4, %s34_s4 }
  0x33   :  { %p1325_p6 = scmp.ne.s32.totalorder %s34_s4, %s1324_s8  ;;  %p1330_p8 = scmp.lt.s32.totalorder %s1324_s8, %s1324_s8 }
  0x35   :  { %p1331_p9 = por %p1330_p8, %p1329_p7 }
  0x37   :  { %p1332_p10 = pnand %p1331_p9, %p1325_p6 }
  0x39   :  { %1335 = shalt.err (!%p1332_p10)
}
  0x3a   :  { %s1763_s30 = sld [smem:[#allocation24_spill]]  ;;  %s1455_s18 = smov [#allocation7]  }
  0x3b   :  { %s52_s19 = sshll.u32 %s1455_s18, 4  ;;  %s1456_s1 = smov [#allocation10]   ;;  %s53_s19 = int_to_ptr.vmem [resolvable:$true] %s52_s19 }
  0x3c   :  { %s80_s20 = sshll.u32 %s1456_s1, 4  ;;  %s1344_s21 = scalar_lea.vmem %s53_s19, 2048  ;;  %s81_s20 = int_to_ptr.vmem [resolvable:$true] %s80_s20 }
  0x3d   :  { %p1345_p11 = scmp.ne.s32.totalorder %s53_s19, %s1344_s21  ;;  %p1349_p12 = scmp.lt.s32.totalorder %s53_s19, %s53_s19 }
  0x3e   :  { %p1350_p13 = scmp.lt.s32.totalorder %s1344_s21, %s1344_s21 }
  0x40   :  { %36 = dma.hbm_to_vmem [thread:$0]  %s1763_s30, 128, %s34_s4, [#allocation3]  }
  0x41   :  { %p1351_p0 = por %p1350_p13, %p1349_p12 }
  0x43   :  { %p1352_p1 = pnand %p1351_p0, %p1345_p11 }
  0x45   :  { %1355 = shalt.err (!%p1352_p1)
}
  0x46   :  { %58 = dma.hbm_to_vmem [thread:$0]  %s1747_s2, 2048, %s53_s19, [#allocation6], %s1451_s0, %s1451_s0, %s1452_s17  }
  0x47   :  { %s1364_s23 = scalar_lea.vmem %s81_s20, 2048  ;;  %p1369_p3 = scmp.lt.s32.totalorder %s81_s20, %s81_s20 }
  0x48   :  { %p1365_p2 = scmp.ne.s32.totalorder %s81_s20, %s1364_s23  ;;  %p1370_p4 = scmp.lt.s32.totalorder %s1364_s23, %s1364_s23 }
  0x4a   :  { %p1371_p5 = por %p1370_p4, %p1369_p3 }
  0x4c   :  { %p1372_p6 = pnand %p1371_p5, %p1365_p2 }
  0x4e   :  { %1375 = shalt.err (!%p1372_p6)
}
  0x4f   :  { %86 = dma.hbm_to_vmem [thread:$0]  %s1751_s6, 2048, %s81_s20, [#allocation9], %s1451_s0, %s1451_s0, %s1452_s17  }
  0x50   :  { %s1457_s25 = smov [#allocation13]   ;;  %s1458_s27 = smov [#allocation16]  }
  0x51   :  { %s108_s26 = sshll.u32 %s1457_s25, 4  ;;  %s136_s2 = sshll.u32 %s1458_s27, 4  ;;  %s109_s26 = int_to_ptr.vmem [resolvable:$true] %s108_s26  ;;  %s137_s2 = int_to_ptr.vmem [resolvable:$true] %s136_s2 }
  0x52   :  { %s1384_s8 = scalar_lea.vmem %s109_s26, 2048  ;;  %p1389_p8 = scmp.lt.s32.totalorder %s109_s26, %s109_s26 }
  0x53   :  { %p1385_p7 = scmp.ne.s32.totalorder %s109_s26, %s1384_s8  ;;  %p1390_p9 = scmp.lt.s32.totalorder %s1384_s8, %s1384_s8 }
  0x55   :  { %p1391_p10 = por %p1390_p9, %p1389_p8 }
  0x57   :  { %p1392_p11 = pnand %p1391_p10, %p1385_p7 }
  0x59   :  { %1395 = shalt.err (!%p1392_p11)
}
  0x5a   :  { %114 = dma.hbm_to_vmem [thread:$0]  %s1755_s10, 2048, %s109_s26, [#allocation12], %s1451_s0, %s1451_s0, %s1452_s17  }
  0x5b   :  { %s1404_s6 = scalar_lea.vmem %s137_s2, 2048  ;;  %p1409_p13 = scmp.lt.s32.totalorder %s137_s2, %s137_s2 }
  0x5c   :  { %p1405_p12 = scmp.ne.s32.totalorder %s137_s2, %s1404_s6  ;;  %p1410_p0 = scmp.lt.s32.totalorder %s1404_s6, %s1404_s6 }
  0x5e   :  { %p1411_p1 = por %p1410_p0, %p1409_p13 }
  0x60   :  { %p1412_p2 = pnand %p1411_p1, %p1405_p12 }
  0x62   :  { %1415 = shalt.err (!%p1412_p2)
}
  0x63   :  { %142 = dma.hbm_to_vmem [thread:$0]  %s1759_s14, 2048, %s137_s2, [#allocation15], %s1451_s0, %s1451_s0, %s1452_s17  }
  0x64   :  { %1436 = dma.done.wait [#allocation3], 128  }
  0x65   :  { %1437 = vsyncadd [#allocation3], 4294967168 }
  0x66   :  { %1438 = dma.done.wait [#allocation6], 2176  }
  0x67   :  { %1439 = vsyncadd [#allocation6], 4294965120 }
  0x68   :  { %1440 = dma.done.wait [#allocation9], 4096  }
  0x69   :  { %1441 = vsyncadd [#allocation9], 4294963200 }
  0x6a   :  { %1442 = dma.done.wait [#allocation12], 4096  }
  0x6b   :  { %1443 = vsyncadd [#allocation12], 4294963200 }
  0x6c   :  { %1444 = dma.done.wait [#allocation15], 4096  }
  0x6d   :  { %1445 = vsyncadd [#allocation15], 4294963200  ;;  %v1459_v0 = vmov 0.0   ;;  %vm1460_vm0 = vmmov 0   ;;  %v188_v1 = vld [vmem:[#allocation7 + $0x78] sm:$0xff]  ;;  %v187_v2 = vld [vmem:[#allocation7 + $0x70] sm:$0xff] }
  0x6e   :  { %977 = vmatprep.subr.mxu0 %v1459_v0  ;;  %1009 = vmatprep.mubr.msk.f32.mxu0 %vm1460_vm0, %v1459_v0  ;;  %v186_v3 = vld [vmem:[#allocation7 + $0x68] sm:$0xff]  ;;  %v185_v4 = vld [vmem:[#allocation7 + $0x60] sm:$0xff]  ;;  %v283_v5 = vld [vmem:[#allocation8 + $0x78] sm:$0xff]  ;;  %s1461_s22 = smov [#allocation17]  }
  0x6f   :  { %1012 = vmatprep.subr.mxu1 %v1459_v0  ;;  %1044 = vmatprep.mubr.msk.f32.mxu1 %vm1460_vm0, %v1459_v0  ;;  %v184_v6 = vld [vmem:[#allocation7 + $0x58] sm:$0xff]  ;;  %v282_v7 = vld [vmem:[#allocation8 + $0x70] sm:$0xff]  ;;  %v281_v8 = vld [vmem:[#allocation8 + $0x68] sm:$0xff]  ;;  %s838_s23 = sshll.u32 %s1461_s22, 4  ;;  %s839_s23 = int_to_ptr.vmem [resolvable:$true] %s838_s23 }
  0x70   :  { %978 = vmatpush3.msra.mxu0 %v188_v1  ;;  %1013 = vmatpush3.msra.mxu1 %v283_v5  ;;  %v183_v9 = vld [vmem:[#allocation7 + $0x50] sm:$0xff]  ;;  %v280_v10 = vld [vmem:[#allocation8 + $0x60] sm:$0xff]  ;;  %v182_v11 = vld [vmem:[#allocation7 + $0x48] sm:$0xff]  ;;  %s1416_s24 = scalar_lea.vmem %s839_s23, 128  ;;  %p1421_p4 = scmp.lt.s32.totalorder %s839_s23, %s839_s23 }
  0x71   :  { %979 = vmatprep.subr.mxu0 %v1459_v0  ;;  %1014 = vmatprep.subr.mxu1 %v1459_v0  ;;  %v279_v12 = vld [vmem:[#allocation8 + $0x58] sm:$0xff]  ;;  %v181_v13 = vld [vmem:[#allocation7 + $0x40] sm:$0xff]  ;;  %v278_v14 = vld [vmem:[#allocation8 + $0x50] sm:$0xff]  ;;  %p1417_p3 = scmp.ne.s32.totalorder %s839_s23, %s1416_s24  ;;  %p1422_p5 = scmp.lt.s32.totalorder %s1416_s24, %s1416_s24 }
  0x72   :  { %980 = vmatpush3.msra.mxu0 %v187_v2  ;;  %1015 = vmatpush3.msra.mxu1 %v282_v7  ;;  %v180_v15 = vld [vmem:[#allocation7 + $0x38] sm:$0xff]  ;;  %v277_v16 = vld [vmem:[#allocation8 + $0x48] sm:$0xff]  ;;  %v179_v17 = vld [vmem:[#allocation7 + $0x30] sm:$0xff] }
  0x73   :  { %981 = vmatprep.subr.mxu0 %v1459_v0  ;;  %1016 = vmatprep.subr.mxu1 %v1459_v0  ;;  %v276_v18 = vld [vmem:[#allocation8 + $0x40] sm:$0xff]  ;;  %v178_v19 = vld [vmem:[#allocation7 + $0x28] sm:$0xff]  ;;  %v275_v20 = vld [vmem:[#allocation8 + $0x38] sm:$0xff]  ;;  %p1423_p6 = por %p1422_p5, %p1421_p4 }
  0x74   :  { %982 = vmatpush3.msra.mxu0 %v186_v3  ;;  %1017 = vmatpush3.msra.mxu1 %v281_v8  ;;  %v177_v21 = vld [vmem:[#allocation7 + $0x20] sm:$0xff]  ;;  %v274_v22 = vld [vmem:[#allocation8 + $0x30] sm:$0xff]  ;;  %v176_v23 = vld [vmem:[#allocation7 + $0x18] sm:$0xff] }
  0x75   :  { %983 = vmatprep.subr.mxu0 %v1459_v0  ;;  %1018 = vmatprep.subr.mxu1 %v1459_v0  ;;  %v273_v24 = vld [vmem:[#allocation8 + $0x28] sm:$0xff]  ;;  %v175_v25 = vld [vmem:[#allocation7 + $0x10] sm:$0xff]  ;;  %v272_v26 = vld [vmem:[#allocation8 + $0x20] sm:$0xff]  ;;  %p1424_p7 = pnand %p1423_p6, %p1417_p3 }
  0x76   :  { %984 = vmatpush3.msra.mxu0 %v185_v4  ;;  %1019 = vmatpush3.msra.mxu1 %v280_v10  ;;  %v174_v27 = vld [vmem:[#allocation7 + $0x8] sm:$0xff]  ;;  %v271_v28 = vld [vmem:[#allocation8 + $0x18] sm:$0xff]  ;;  %v173_v29 = vld [vmem:[#allocation7] sm:$0xff] }
  0x77   :  { %985 = vmatprep.subr.mxu0 %v1459_v0  ;;  %1020 = vmatprep.subr.mxu1 %v1459_v0  ;;  %v172_v30 = vld [vmem:[#allocation2] sm:$0xff]  ;;  %v269_v32 = vld [vmem:[#allocation8 + $0x8] sm:$0xff]  ;;  %v268_v33 = vld [vmem:[#allocation8] sm:$0xff] }
  0x78   :  { %986 = vmatpush3.msra.mxu0 %v184_v6  ;;  %1021 = vmatpush3.msra.mxu1 %v279_v12  ;;  %v270_v31 = vld [vmem:[#allocation8 + $0x10] sm:$0xff]  ;;  %v377_v34 = vld [vmem:[#allocation10 + $0x78] sm:$0xff]  ;;  %v375_v36 = vld [vmem:[#allocation10 + $0x68] sm:$0xff] }
  0x79   :  { %987 = vmatprep.subr.mxu0 %v1459_v0  ;;  %1022 = vmatprep.subr.mxu1 %v1459_v0  ;;  %v376_v35 = vld [vmem:[#allocation10 + $0x70] sm:$0xff]  ;;  %v374_v37 = vld [vmem:[#allocation10 + $0x60] sm:$0xff]  ;;  %v373_v38 = vld [vmem:[#allocation10 + $0x58] sm:$0xff] }
  0x7a   :  { %988 = vmatpush3.msra.mxu0 %v183_v9  ;;  %1023 = vmatpush3.msra.mxu1 %v278_v14  ;;  %v372_v39 = vld [vmem:[#allocation10 + $0x50] sm:$0xff]  ;;  %v371_v40 = vld [vmem:[#allocation10 + $0x48] sm:$0xff]  ;;  %v370_v41 = vld [vmem:[#allocation10 + $0x40] sm:$0xff] }
  0x7b   :  { %989 = vmatprep.subr.mxu0 %v1459_v0  ;;  %1024 = vmatprep.subr.mxu1 %v1459_v0  ;;  %v369_v42 = vld [vmem:[#allocation10 + $0x38] sm:$0xff]  ;;  %v368_v43 = vld [vmem:[#allocation10 + $0x30] sm:$0xff]  ;;  %v367_v44 = vld [vmem:[#allocation10 + $0x28] sm:$0xff] }
  0x7c   :  { %990 = vmatpush3.msra.mxu0 %v182_v11  ;;  %1025 = vmatpush3.msra.mxu1 %v277_v16  ;;  %v366_v45 = vld [vmem:[#allocation10 + $0x20] sm:$0xff]  ;;  %v365_v46 = vld [vmem:[#allocation10 + $0x18] sm:$0xff]  ;;  %v851_v47 = vld [vmem:[%s1748_s3] ss:$0 sm:$0xff] }
  0x7d   :  { %991 = vmatprep.subr.mxu0 %v1459_v0  ;;  %1026 = vmatprep.subr.mxu1 %v1459_v0  ;;  %v266_v49 = vld [vmem:[#allocation5] sm:$0xff]  ;;  %v364_v53 = vld [vmem:[#allocation10 + $0x10] sm:$0xff]  ;;  %v363_v54 = vld [vmem:[#allocation10 + $0x8] sm:$0xff] }
  0x7e   :  { %992 = vmatpush3.msra.mxu0 %v181_v13  ;;  %1027 = vmatpush3.msra.mxu1 %v276_v18  ;;  %v362_v55 = vld [vmem:[#allocation10] sm:$0xff]  ;;  %v471_v56 = vld [vmem:[#allocation11 + $0x78] sm:$0xff]  ;;  %v470_v57 = vld [vmem:[#allocation11 + $0x70] sm:$0xff] }
  0x7f   :  { %993 = vmatprep.subr.mxu0 %v1459_v0  ;;  %1028 = vmatprep.subr.mxu1 %v1459_v0  ;;  %v469_v58 = vld [vmem:[#allocation11 + $0x68] sm:$0xff]  ;;  %v468_v59 = vld [vmem:[#allocation11 + $0x60] sm:$0xff]  ;;  %v467_v60 = vld [vmem:[#allocation11 + $0x58] sm:$0xff] }
  0x80   :  { %994 = vmatpush3.msra.mxu0 %v180_v15  ;;  %1029 = vmatpush3.msra.mxu1 %v275_v20  ;;  %v466_v61 = vld [vmem:[#allocation11 + $0x50] sm:$0xff]  ;;  %v465_v62 = vld [vmem:[#allocation11 + $0x48] sm:$0xff]  ;;  %v464_v63 = vld [vmem:[#allocation11 + $0x40] sm:$0xff] }
  0x81   :  { %995 = vmatprep.subr.mxu0 %v1459_v0  ;;  %1030 = vmatprep.subr.mxu1 %v1459_v0  ;;  %v463_v1 = vld [vmem:[#allocation11 + $0x38] sm:$0xff]  ;;  %v462_v2 = vld [vmem:[#allocation11 + $0x30] sm:$0xff]  ;;  %v461_v3 = vld [vmem:[#allocation11 + $0x28] sm:$0xff] }
  0x82   :  { %996 = vmatpush3.msra.mxu0 %v179_v17  ;;  %1031 = vmatpush3.msra.mxu1 %v274_v22  ;;  %v460_v4 = vld [vmem:[#allocation11 + $0x20] sm:$0xff]  ;;  %v459_v5 = vld [vmem:[#allocation11 + $0x18] sm:$0xff]  ;;  %v852_v6 = vld [vmem:[%s1750_s5] ss:$0 sm:$0xff] }
  0x83   :  { %997 = vmatprep.subr.mxu0 %v1459_v0  ;;  %1032 = vmatprep.subr.mxu1 %v1459_v0  ;;  %v458_v11 = vld [vmem:[#allocation11 + $0x10] sm:$0xff]  ;;  %v457_v12 = vld [vmem:[#allocation11 + $0x8] sm:$0xff]  ;;  %v456_v13 = vld [vmem:[#allocation11] sm:$0xff] }
  0x84   :  { %998 = vmatpush3.msra.mxu0 %v178_v19  ;;  %1033 = vmatpush3.msra.mxu1 %v273_v24  ;;  %v565_v14 = vld [vmem:[#allocation13 + $0x78] sm:$0xff]  ;;  %v564_v15 = vld [vmem:[#allocation13 + $0x70] sm:$0xff]  ;;  %v563_v16 = vld [vmem:[#allocation13 + $0x68] sm:$0xff] }
  0x85   :  { %999 = vmatprep.subr.mxu0 %v1459_v0  ;;  %1034 = vmatprep.subr.mxu1 %v1459_v0  ;;  %v562_v17 = vld [vmem:[#allocation13 + $0x60] sm:$0xff]  ;;  %v561_v18 = vld [vmem:[#allocation13 + $0x58] sm:$0xff]  ;;  %v560_v19 = vld [vmem:[#allocation13 + $0x50] sm:$0xff] }
  0x86   :  { %1000 = vmatpush3.msra.mxu0 %v177_v21  ;;  %1035 = vmatpush3.msra.mxu1 %v272_v26  ;;  %v559_v20 = vld [vmem:[#allocation13 + $0x48] sm:$0xff]  ;;  %v558_v21 = vld [vmem:[#allocation13 + $0x40] sm:$0xff]  ;;  %v557_v22 = vld [vmem:[#allocation13 + $0x38] sm:$0xff] }
  0x87   :  { %1001 = vmatprep.subr.mxu0 %v1459_v0  ;;  %1036 = vmatprep.subr.mxu1 %v1459_v0  ;;  %v555_v24 = vld [vmem:[#allocation13 + $0x28] sm:$0xff]  ;;  %v553_v26 = vld [vmem:[#allocation13 + $0x18] sm:$0xff] }
  0x88   :  { %1002 = vmatpush3.msra.mxu0 %v176_v23  ;;  %1037 = vmatpush3.msra.mxu1 %v271_v28  ;;  %v556_v23 = vld [vmem:[#allocation13 + $0x30] sm:$0xff] }
  0x89   :  { %1003 = vmatprep.subr.mxu0 %v1459_v0  ;;  %1038 = vmatprep.subr.mxu1 %v1459_v0 }
  0x8a   :  { %1004 = vmatpush3.msra.mxu0 %v175_v25  ;;  %1039 = vmatpush3.msra.mxu1 %v270_v31  ;;  %v554_v25 = vld [vmem:[#allocation13 + $0x20] sm:$0xff] }
  0x8b   :  { %1005 = vmatprep.subr.mxu0 %v1459_v0  ;;  %1040 = vmatprep.subr.mxu1 %v1459_v0 }
  0x8c   :  { %1006 = vmatpush3.msra.mxu0 %v174_v27  ;;  %1041 = vmatpush3.msra.mxu1 %v269_v32  ;;  %v853_v27 = vld [vmem:[%s1752_s7] ss:$0 sm:$0xff] }
  0x8d   :  { %1007 = vmatprep.subr.mxu0 %v1459_v0  ;;  %1042 = vmatprep.subr.mxu1 %v1459_v0  ;;  %v552_v32 = vld [vmem:[#allocation13 + $0x10] sm:$0xff] }
  0x8e   :  { %1008 = vmatpush3.msra.mxu0 %v173_v29  ;;  %1043 = vmatpush3.msra.mxu1 %v268_v33  ;;  %v551_v33 = vld [vmem:[#allocation13 + $0x8] sm:$0xff] }
  0x8f   :  { %1010 = vmatmul.mubr.f32.vlgmr.msra.gmra.mxu0 %v172_v30  ;;  %1047 = vmatprep.subr.mxu0 %v1459_v0 }
  0x90   :  { %1079 = vmatprep.mubr.msk.f32.mxu0 %vm1460_vm0, %v1459_v0  ;;  %1082 = vmatprep.subr.mxu1 %v1459_v0 }
  0x91   :  { %1048 = vmatpush3.msra.mxu0 %v377_v34  ;;  %v550_v34 = vld [vmem:[#allocation13] sm:$0xff] }
  0x92   :  { %1049 = vmatprep.subr.mxu0 %v1459_v0 }
  0x93   :  { %1050 = vmatpush3.msra.mxu0 %v376_v35  ;;  %v659_v35 = vld [vmem:[#allocation14 + $0x78] sm:$0xff] }
  0x94   :  { %1051 = vmatprep.subr.mxu0 %v1459_v0 }
  0x95   :  { %1052 = vmatpush3.msra.mxu0 %v375_v36  ;;  %v658_v36 = vld [vmem:[#allocation14 + $0x70] sm:$0xff] }
  0x96   :  { %1053 = vmatprep.subr.mxu0 %v1459_v0 }
  0x97   :  { %1054 = vmatpush3.msra.mxu0 %v374_v37  ;;  %v657_v37 = vld [vmem:[#allocation14 + $0x68] sm:$0xff] }
  0x98   :  { %1055 = vmatprep.subr.mxu0 %v1459_v0 }
  0x99   :  { %1056 = vmatpush3.msra.mxu0 %v373_v38  ;;  %v656_v38 = vld [vmem:[#allocation14 + $0x60] sm:$0xff] }
  0x9a   :  { %1057 = vmatprep.subr.mxu0 %v1459_v0 }
  0x9b   :  { %1058 = vmatpush3.msra.mxu0 %v372_v39  ;;  %v655_v39 = vld [vmem:[#allocation14 + $0x58] sm:$0xff] }
  0x9c   :  { %1059 = vmatprep.subr.mxu0 %v1459_v0 }
  0x9d   :  { %1060 = vmatpush3.msra.mxu0 %v371_v40  ;;  %v654_v40 = vld [vmem:[#allocation14 + $0x50] sm:$0xff] }
  0x9e   :  { %1061 = vmatprep.subr.mxu0 %v1459_v0 }
  0x9f   :  { %1062 = vmatpush3.msra.mxu0 %v370_v41  ;;  %v653_v41 = vld [vmem:[#allocation14 + $0x48] sm:$0xff] }
  0xa0   :  { %1063 = vmatprep.subr.mxu0 %v1459_v0 }
  0xa1   :  { %1064 = vmatpush3.msra.mxu0 %v369_v42  ;;  %v652_v42 = vld [vmem:[#allocation14 + $0x40] sm:$0xff] }
  0xa2   :  { %1065 = vmatprep.subr.mxu0 %v1459_v0 }
  0xa3   :  { %1066 = vmatpush3.msra.mxu0 %v368_v43  ;;  %v651_v43 = vld [vmem:[#allocation14 + $0x38] sm:$0xff] }
  0xa4   :  { %1067 = vmatprep.subr.mxu0 %v1459_v0 }
  0xa5   :  { %1068 = vmatpush3.msra.mxu0 %v367_v44  ;;  %v650_v44 = vld [vmem:[#allocation14 + $0x30] sm:$0xff] }
  0xa6   :  { %1069 = vmatprep.subr.mxu0 %v1459_v0 }
  0xa7   :  { %1070 = vmatpush3.msra.mxu0 %v366_v45  ;;  %v649_v45 = vld [vmem:[#allocation14 + $0x28] sm:$0xff] }
  0xa8   :  { %1071 = vmatprep.subr.mxu0 %v1459_v0 }
  0xa9   :  { %1072 = vmatpush3.msra.mxu0 %v365_v46  ;;  %v648_v46 = vld [vmem:[#allocation14 + $0x20] sm:$0xff] }
  0xaa   :  { %1073 = vmatprep.subr.mxu0 %v1459_v0 }
  0xab   :  { %1074 = vmatpush3.msra.mxu0 %v364_v53  ;;  %v646_v53 = vld [vmem:[#allocation14 + $0x10] sm:$0xff] }
  0xac   :  { %1075 = vmatprep.subr.mxu0 %v1459_v0 }
  0xad   :  { %1076 = vmatpush3.msra.mxu0 %v363_v54  ;;  %v645_v54 = vld [vmem:[#allocation14 + $0x8] sm:$0xff] }
  0xae   :  { %1077 = vmatprep.subr.mxu0 %v1459_v0 }
  0xaf   :  { %1078 = vmatpush3.msra.mxu0 %v362_v55  ;;  %v644_v55 = vld [vmem:[#allocation14] sm:$0xff] }
  0xb0   :  { %1117 = vmatprep.subr.mxu0 %v1459_v0 }
 0x14f   :  { %v262_v48 = vpop.f32.mrf.mxu0 }
 0x150   :  { %v263_v50 = vadd.f32 %v851_v47, %v262_v48  ;;  %v647_v47 = vld [vmem:[#allocation14 + $0x18] sm:$0xff]  ;;  %v854_v48 = vld [vmem:[%s1754_s9] ss:$0 sm:$0xff] }
 0x151   :  { %v1011_v51 = vpop.f32.mrf.mxu0 }
 0x152   :  { %v267_v52 = vadd.f32 %v266_v49, %v263_v50 }
 0x154   :  { %1045 = vmatmul.mubr.f32.vlgmr.msra.gmra.mxu1 %v267_v52 }
 0x155   :  { %1114 = vmatprep.mubr.msk.f32.mxu1 %vm1460_vm0, %v1459_v0  ;;  %1083 = vmatpush3.msra.mxu1 %v471_v56  ;;  %v753_v56 = vld [vmem:[#allocation16 + $0x78] sm:$0xff] }
 0x156   :  { %1084 = vmatprep.subr.mxu1 %v1459_v0 }
 0x157   :  { %1085 = vmatpush3.msra.mxu1 %v470_v57  ;;  %v752_v57 = vld [vmem:[#allocation16 + $0x70] sm:$0xff] }
 0x158   :  { %1086 = vmatprep.subr.mxu1 %v1459_v0 }
 0x159   :  { %1087 = vmatpush3.msra.mxu1 %v469_v58  ;;  %v751_v58 = vld [vmem:[#allocation16 + $0x68] sm:$0xff] }
 0x15a   :  { %1088 = vmatprep.subr.mxu1 %v1459_v0 }
 0x15b   :  { %1089 = vmatpush3.msra.mxu1 %v468_v59  ;;  %v750_v59 = vld [vmem:[#allocation16 + $0x60] sm:$0xff] }
 0x15c   :  { %1090 = vmatprep.subr.mxu1 %v1459_v0 }
 0x15d   :  { %1091 = vmatpush3.msra.mxu1 %v467_v60  ;;  %v749_v60 = vld [vmem:[#allocation16 + $0x58] sm:$0xff] }
 0x15e   :  { %1092 = vmatprep.subr.mxu1 %v1459_v0 }
 0x15f   :  { %1093 = vmatpush3.msra.mxu1 %v466_v61  ;;  %v748_v61 = vld [vmem:[#allocation16 + $0x50] sm:$0xff] }
 0x160   :  { %1094 = vmatprep.subr.mxu1 %v1459_v0 }
 0x161   :  { %1095 = vmatpush3.msra.mxu1 %v465_v62  ;;  %v747_v62 = vld [vmem:[#allocation16 + $0x48] sm:$0xff] }
 0x162   :  { %1096 = vmatprep.subr.mxu1 %v1459_v0 }
 0x163   :  { %1097 = vmatpush3.msra.mxu1 %v464_v63  ;;  %v746_v63 = vld [vmem:[#allocation16 + $0x40] sm:$0xff] }
 0x164   :  { %1098 = vmatprep.subr.mxu1 %v1459_v0 }
 0x165   :  { %1099 = vmatpush3.msra.mxu1 %v463_v1  ;;  %v745_v1 = vld [vmem:[#allocation16 + $0x38] sm:$0xff] }
 0x166   :  { %1100 = vmatprep.subr.mxu1 %v1459_v0 }
 0x167   :  { %1101 = vmatpush3.msra.mxu1 %v462_v2  ;;  %v744_v2 = vld [vmem:[#allocation16 + $0x30] sm:$0xff] }
 0x168   :  { %1102 = vmatprep.subr.mxu1 %v1459_v0 }
 0x169   :  { %1103 = vmatpush3.msra.mxu1 %v461_v3  ;;  %v743_v3 = vld [vmem:[#allocation16 + $0x28] sm:$0xff] }
 0x16a   :  { %1104 = vmatprep.subr.mxu1 %v1459_v0 }
 0x16b   :  { %1105 = vmatpush3.msra.mxu1 %v460_v4  ;;  %v742_v4 = vld [vmem:[#allocation16 + $0x20] sm:$0xff] }
 0x16c   :  { %1106 = vmatprep.subr.mxu1 %v1459_v0 }
 0x16d   :  { %1107 = vmatpush3.msra.mxu1 %v459_v5  ;;  %v741_v5 = vld [vmem:[#allocation16 + $0x18] sm:$0xff] }
 0x16e   :  { %1108 = vmatprep.subr.mxu1 %v1459_v0 }
 0x16f   :  { %1109 = vmatpush3.msra.mxu1 %v458_v11  ;;  %v740_v11 = vld [vmem:[#allocation16 + $0x10] sm:$0xff] }
 0x170   :  { %1110 = vmatprep.subr.mxu1 %v1459_v0 }
 0x171   :  { %1111 = vmatpush3.msra.mxu1 %v457_v12  ;;  %v739_v12 = vld [vmem:[#allocation16 + $0x8] sm:$0xff] }
 0x172   :  { %1112 = vmatprep.subr.mxu1 %v1459_v0 }
 0x173   :  { %1113 = vmatpush3.msra.mxu1 %v456_v13  ;;  %v738_v13 = vld [vmem:[#allocation16] sm:$0xff] }
 0x174   :  { %1152 = vmatprep.subr.mxu1 %v1459_v0 }
 0x214   :  { %v357_v7 = vpop.f32.mrf.mxu1 }
 0x215   :  { %v358_v8 = vadd.f32 %v852_v6, %v357_v7  ;;  %v855_v6 = vld [vmem:[%s1756_s11] ss:$0 sm:$0xff] }
 0x216   :  { %v1046_v9 = vpop.f32.mrf.mxu1 }
 0x217   :  { %v361_v10 = vmax.f32 %v358_v8, 0.0 }
 0x219   :  { %1080 = vmatmul.mubr.f32.vlgmr.msra.gmra.mxu0 %v361_v10 }
 0x21a   :  { %1149 = vmatprep.mubr.msk.f32.mxu0 %vm1460_vm0, %v1459_v0  ;;  %1118 = vmatpush3.msra.mxu0 %v565_v14  ;;  %v856_v14 = vld [vmem:[%s1758_s13] ss:$0 sm:$0xff] }
 0x21b   :  { %1119 = vmatprep.subr.mxu0 %v1459_v0 }
 0x21c   :  { %1120 = vmatpush3.msra.mxu0 %v564_v15 }
 0x21d   :  { %1121 = vmatprep.subr.mxu0 %v1459_v0 }
 0x21e   :  { %1122 = vmatpush3.msra.mxu0 %v563_v16 }
 0x21f   :  { %1123 = vmatprep.subr.mxu0 %v1459_v0 }
 0x220   :  { %1124 = vmatpush3.msra.mxu0 %v562_v17 }
 0x221   :  { %1125 = vmatprep.subr.mxu0 %v1459_v0 }
 0x222   :  { %1126 = vmatpush3.msra.mxu0 %v561_v18 }
 0x223   :  { %1127 = vmatprep.subr.mxu0 %v1459_v0 }
 0x224   :  { %1128 = vmatpush3.msra.mxu0 %v560_v19  ;;  %v857_v19 = vld [vmem:[%s1760_s15] ss:$0 sm:$0xff] }
 0x225   :  { %1129 = vmatprep.subr.mxu0 %v1459_v0 }
 0x226   :  { %1130 = vmatpush3.msra.mxu0 %v559_v20 }
 0x227   :  { %1131 = vmatprep.subr.mxu0 %v1459_v0 }
 0x228   :  { %1132 = vmatpush3.msra.mxu0 %v558_v21 }
 0x229   :  { %1133 = vmatprep.subr.mxu0 %v1459_v0 }
 0x22a   :  { %1134 = vmatpush3.msra.mxu0 %v557_v22 }
 0x22b   :  { %1135 = vmatprep.subr.mxu0 %v1459_v0 }
 0x22c   :  { %1136 = vmatpush3.msra.mxu0 %v556_v23 }
 0x22d   :  { %1137 = vmatprep.subr.mxu0 %v1459_v0 }
 0x22e   :  { %1138 = vmatpush3.msra.mxu0 %v555_v24 }
 0x22f   :  { %1139 = vmatprep.subr.mxu0 %v1459_v0 }
 0x230   :  { %1140 = vmatpush3.msra.mxu0 %v554_v25 }
 0x231   :  { %1141 = vmatprep.subr.mxu0 %v1459_v0 }
 0x232   :  { %1142 = vmatpush3.msra.mxu0 %v553_v26 }
 0x233   :  { %1143 = vmatprep.subr.mxu0 %v1459_v0 }
 0x234   :  { %1144 = vmatpush3.msra.mxu0 %v552_v32 }
 0x235   :  { %1145 = vmatprep.subr.mxu0 %v1459_v0 }
 0x236   :  { %1146 = vmatpush3.msra.mxu0 %v551_v33 }
 0x237   :  { %1147 = vmatprep.subr.mxu0 %v1459_v0 }
 0x238   :  { %1148 = vmatpush3.msra.mxu0 %v550_v34 }
 0x239   :  { %1187 = vmatprep.subr.mxu0 %v1459_v0 }
 0x2d9   :  { %v451_v28 = vpop.f32.mrf.mxu0 }
 0x2da   :  { %v452_v29 = vadd.f32 %v853_v27, %v451_v28 }
 0x2db   :  { %v1081_v30 = vpop.f32.mrf.mxu0 }
 0x2dc   :  { %v455_v31 = vmax.f32 %v452_v29, 0.0 }
 0x2de   :  { %1115 = vmatmul.mubr.f32.vlgmr.msra.gmra.mxu1 %v455_v31 }
 0x2df   :  { %1184 = vmatprep.mubr.msk.f32.mxu1 %vm1460_vm0, %v1459_v0  ;;  %1153 = vmatpush3.msra.mxu1 %v659_v35 }
 0x2e0   :  { %1154 = vmatprep.subr.mxu1 %v1459_v0 }
 0x2e1   :  { %1155 = vmatpush3.msra.mxu1 %v658_v36 }
 0x2e2   :  { %1156 = vmatprep.subr.mxu1 %v1459_v0 }
 0x2e3   :  { %1157 = vmatpush3.msra.mxu1 %v657_v37 }
 0x2e4   :  { %1158 = vmatprep.subr.mxu1 %v1459_v0 }
 0x2e5   :  { %1159 = vmatpush3.msra.mxu1 %v656_v38 }
 0x2e6   :  { %1160 = vmatprep.subr.mxu1 %v1459_v0 }
 0x2e7   :  { %1161 = vmatpush3.msra.mxu1 %v655_v39 }
 0x2e8   :  { %1162 = vmatprep.subr.mxu1 %v1459_v0 }
 0x2e9   :  { %1163 = vmatpush3.msra.mxu1 %v654_v40 }
 0x2ea   :  { %1164 = vmatprep.subr.mxu1 %v1459_v0 }
 0x2eb   :  { %1165 = vmatpush3.msra.mxu1 %v653_v41 }
 0x2ec   :  { %1166 = vmatprep.subr.mxu1 %v1459_v0 }
 0x2ed   :  { %1167 = vmatpush3.msra.mxu1 %v652_v42 }
 0x2ee   :  { %1168 = vmatprep.subr.mxu1 %v1459_v0 }
 0x2ef   :  { %1169 = vmatpush3.msra.mxu1 %v651_v43 }
 0x2f0   :  { %1170 = vmatprep.subr.mxu1 %v1459_v0 }
 0x2f1   :  { %1171 = vmatpush3.msra.mxu1 %v650_v44 }
 0x2f2   :  { %1172 = vmatprep.subr.mxu1 %v1459_v0 }
 0x2f3   :  { %1173 = vmatpush3.msra.mxu1 %v649_v45 }
 0x2f4   :  { %1174 = vmatprep.subr.mxu1 %v1459_v0 }
 0x2f5   :  { %1175 = vmatpush3.msra.mxu1 %v648_v46 }
 0x2f6   :  { %1176 = vmatprep.subr.mxu1 %v1459_v0 }
 0x2f7   :  { %1177 = vmatpush3.msra.mxu1 %v647_v47 }
 0x2f8   :  { %1178 = vmatprep.subr.mxu1 %v1459_v0 }
 0x2f9   :  { %1179 = vmatpush3.msra.mxu1 %v646_v53 }
 0x2fa   :  { %1180 = vmatprep.subr.mxu1 %v1459_v0 }
 0x2fb   :  { %1181 = vmatpush3.msra.mxu1 %v645_v54 }
 0x2fc   :  { %1182 = vmatprep.subr.mxu1 %v1459_v0 }
 0x2fd   :  { %1183 = vmatpush3.msra.mxu1 %v644_v55 }
 0x39e   :  { %v545_v49 = vpop.f32.mrf.mxu1 }
 0x39f   :  { %v546_v50 = vadd.f32 %v854_v48, %v545_v49 }
 0x3a0   :  { %v1116_v51 = vpop.f32.mrf.mxu1 }
 0x3a1   :  { %v549_v52 = vmax.f32 %v546_v50, 0.0 }
 0x3a3   :  { %1150 = vmatmul.mubr.f32.vlgmr.msra.gmra.mxu0 %v549_v52 }
 0x3a4   :  { %1219 = vmatprep.mubr.msk.f32.mxu0 %vm1460_vm0, %v1459_v0  ;;  %1188 = vmatpush3.msra.mxu0 %v753_v56 }
 0x3a5   :  { %1189 = vmatprep.subr.mxu0 %v1459_v0 }
 0x3a6   :  { %1190 = vmatpush3.msra.mxu0 %v752_v57 }
 0x3a7   :  { %1191 = vmatprep.subr.mxu0 %v1459_v0 }
 0x3a8   :  { %1192 = vmatpush3.msra.mxu0 %v751_v58 }
 0x3a9   :  { %1193 = vmatprep.subr.mxu0 %v1459_v0 }
 0x3aa   :  { %1194 = vmatpush3.msra.mxu0 %v750_v59 }
 0x3ab   :  { %1195 = vmatprep.subr.mxu0 %v1459_v0 }
 0x3ac   :  { %1196 = vmatpush3.msra.mxu0 %v749_v60 }
 0x3ad   :  { %1197 = vmatprep.subr.mxu0 %v1459_v0 }
 0x3ae   :  { %1198 = vmatpush3.msra.mxu0 %v748_v61 }
 0x3af   :  { %1199 = vmatprep.subr.mxu0 %v1459_v0 }
 0x3b0   :  { %1200 = vmatpush3.msra.mxu0 %v747_v62 }
 0x3b1   :  { %1201 = vmatprep.subr.mxu0 %v1459_v0 }
 0x3b2   :  { %1202 = vmatpush3.msra.mxu0 %v746_v63 }
 0x3b3   :  { %1203 = vmatprep.subr.mxu0 %v1459_v0 }
 0x3b4   :  { %1204 = vmatpush3.msra.mxu0 %v745_v1 }
 0x3b5   :  { %1205 = vmatprep.subr.mxu0 %v1459_v0 }
 0x3b6   :  { %1206 = vmatpush3.msra.mxu0 %v744_v2 }
 0x3b7   :  { %1207 = vmatprep.subr.mxu0 %v1459_v0 }
 0x3b8   :  { %1208 = vmatpush3.msra.mxu0 %v743_v3 }
 0x3b9   :  { %1209 = vmatprep.subr.mxu0 %v1459_v0 }
 0x3ba   :  { %1210 = vmatpush3.msra.mxu0 %v742_v4 }
 0x3bb   :  { %1211 = vmatprep.subr.mxu0 %v1459_v0 }
 0x3bc   :  { %1212 = vmatpush3.msra.mxu0 %v741_v5 }
 0x3bd   :  { %1213 = vmatprep.subr.mxu0 %v1459_v0 }
 0x3be   :  { %1214 = vmatpush3.msra.mxu0 %v740_v11 }
 0x3bf   :  { %1215 = vmatprep.subr.mxu0 %v1459_v0 }
 0x3c0   :  { %1216 = vmatpush3.msra.mxu0 %v739_v12 }
 0x3c1   :  { %1217 = vmatprep.subr.mxu0 %v1459_v0 }
 0x3c2   :  { %1218 = vmatpush3.msra.mxu0 %v738_v13 }
 0x463   :  { %v639_v7 = vpop.f32.mrf.mxu0 }
 0x464   :  { %v640_v8 = vadd.f32 %v855_v6, %v639_v7 }
 0x465   :  { %v1151_v9 = vpop.f32.mrf.mxu0 }
 0x466   :  { %v643_v10 = vmax.f32 %v640_v8, 0.0 }
 0x468   :  { %1185 = vmatmul.mubr.f32.vlgmr.msra.gmra.mxu1 %v643_v10 }
 0x528   :  { %v733_v15 = vpop.f32.mrf.mxu1 }
 0x529   :  { %v734_v16 = vadd.f32 %v856_v14, %v733_v15 }
 0x52a   :  { %v1186_v17 = vpop.f32.mrf.mxu1 }
 0x52b   :  { %v737_v18 = vmax.f32 %v734_v16, 0.0 }
 0x52d   :  { %1220 = vmatmul.mubr.f32.vlgmr.msra.gmra.mxu0 %v737_v18 }
 0x5ed   :  { %v827_v20 = vpop.f32.mrf.mxu0 }
 0x5ee   :  { %v828_v21 = vadd.f32 %v857_v19, %v827_v20 }
 0x5ef   :  { %v1221_v0 = vpop.f32.mrf.mxu0 }
 0x5f0   :  { %831 = vst [vmem:[#allocation17] sm:$0xff] %v828_v21 }
 0x5f1   :  { %1427 = shalt.err (!%p1424_p7)
}
 0x5f2   :  { %841 = dma.vmem_to_hbm [thread:$0]  %s839_s23, 128, %s1761_s16, [#allocation4]  }
 0x5f3   :  { %1446 = dma.done.wait [#allocation4], 128  }
 0x5f4   :  { %1447 = vsyncadd [#allocation4], 4294967168 }
 0x5f5   :  { %845 = vsyncpa [#allocation3], 1 }
 0x5f6   :  { %846 = vsyncpa [#allocation6], 1 }
 0x5f7   :  { %847 = vsyncpa [#allocation9], 1 }
 0x5f8   :  { %848 = vsyncpa [#allocation12], 1 }
 0x5f9   :  { %849 = vsyncpa [#allocation15], 1 }
 0x5fa   :  { %850 = vsyncpa [#allocation4], 1 }

</bundles_post_ra>
